<compile_context>
chip_gen: v7x
topology: tpu7x:2x2x1
jax: 0.10.0
libtpu: 0.0.40
codegen_flags: <defaults>
</compile_context>

<pallas_src>
import functools

import jax
import jax.numpy as jnp
from jax.experimental import pallas as pl
from jax.experimental.pallas import tpu as pltpu

NEG_SLOPE = 0.01   # nn.LeakyReLU default negative_slope
BN_EPS = 1e-5      # nn.BatchNorm2d default eps


# ---------------------------------------------------------------------------
# Tiling helpers (generation-aware)
# ---------------------------------------------------------------------------
def _vmem_capacity_bytes():
    try:
        return int(pltpu.get_tpu_info().vmem_capacity_bytes)
    except Exception:
        return 64 << 20   # conservative default (v7x per-core VMEM)


def _pick_tm(M, K, N, max_tm=1024):
    """Largest M tile (multiple of 8, <= M) whose double-buffered f32
    footprint stays well under the current chip's VMEM capacity."""
    budget = _vmem_capacity_bytes() // 4
    tm = max_tm
    while tm > 8 and 2 * 4 * (tm * K + K * N + tm * N) > budget:
        tm //= 2
    if M >= 8:
        tm = min(tm, (M // 8) * 8)
    else:
        tm = M
    return max(tm, 1)


def _vmem_limit(tm, K, N):
    need = 2 * 4 * (tm * K + K * N + tm * N) + (4 << 20)
    return min(int(0.75 * _vmem_capacity_bytes()), max(32 << 20, need))


# ---------------------------------------------------------------------------
# Pallas kernels
# ---------------------------------------------------------------------------
def _fused_conv1_shortcut_kernel(p_ref, w_ref, b_ref, o1_ref, o2_ref, *, n1):
    """(tm, K) @ (K, 2*Cout) with BN folded into the weights.
    Columns [:n1]  -> conv1 path: bias + LeakyReLU.
    Columns [n1:]  -> 1x1 shortcut path: bias only."""
    acc = jnp.dot(p_ref[...], w_ref[...], preferred_element_type=jnp.float32)
    acc = acc + b_ref[...]
    y1 = acc[:, :n1]
    o1_ref[...] = jnp.where(y1 >= 0, y1, NEG_SLOPE * y1).astype(o1_ref.dtype)
    o2_ref[...] = acc[:, n1:].astype(o2_ref.dtype)


def _matmul_bias_kernel(p_ref, w_ref, b_ref, o_ref, *, leaky):
    """(tm, K) @ (K, N) + bias (+ optional LeakyReLU)."""
    acc = jnp.dot(p_ref[...], w_ref[...], preferred_element_type=jnp.float32)
    acc = acc + b_ref[...]
    if leaky:
        acc = jnp.where(acc >= 0, acc, NEG_SLOPE * acc)
    o_ref[...] = acc.astype(o_ref.dtype)


def _se_gate_kernel(x_ref, w1t_ref, w2t_ref, g_ref, sum_ref, *, hw_total, thw):
    """Tiled global-avg-pool over HW + FC -> ReLU -> FC -> sigmoid.
    x_ref: (B, thw, C) tile; g_ref: (B, C) gates (written on last step)."""
    j = pl.program_id(0)

    @pl.when(j == 0)
    def _():
        sum_ref[...] = jnp.zeros_like(sum_ref)

    x = x_ref[...]
    idx = j * thw + jax.lax.broadcasted_iota(jnp.int32, (1, thw, 1), 1)
    x = jnp.where(idx < hw_total, x, 0.0)       # mask ragged last HW tile
    sum_ref[...] += jnp.sum(x, axis=1)

    @pl.when(j == pl.num_programs(0) - 1)
    def _():
        mean = sum_ref[...] * (1.0 / hw_total)
        h = jnp.maximum(
            jnp.dot(mean, w1t_ref[...], preferred_element_type=jnp.float32), 0.0)
        g_ref[...] = jax.nn.sigmoid(
            jnp.dot(h, w2t_ref[...], preferred_element_type=jnp.float32))


def _se_residual_kernel(x_ref, sc_ref, g_ref, o_ref):
    """out = LeakyReLU(x * gate + shortcut); x/sc/o: (1, thw, C), g: (1,1,C)."""
    y = x_ref[...] * g_ref[...] + sc_ref[...]
    o_ref[...] = jnp.where(y >= 0, y, NEG_SLOPE * y).astype(o_ref.dtype)


# ---------------------------------------------------------------------------
# Glue: patch extraction (NHWC, H-only kernel), pallas_call wrappers
# ---------------------------------------------------------------------------
def _shift_patches_h(x_nhwc, kh, ph, stride):
    """x: (B, H, W, C) -> patches (B, Ho, Wo, kh*C) for a (kh, 1) kernel with
    padding (ph, 0) and stride (stride, stride).  Tap-major / channel-fast
    ordering (matches w.transpose(2,3,1,0).reshape(kh*C, Cout))."""
    B, H, W, C = x_nhwc.shape
    Ho = (H + 2 * ph - kh) // stride + 1
    Wo = (W - 1) // stride + 1
    xp = jnp.pad(x_nhwc, ((0, 0), (ph, ph), (0, 0), (0, 0)))
    taps = []
    for i in range(kh):
        taps.append(xp[:, i:i + (Ho - 1) * stride + 1:stride, ::stride, :])
    return jnp.concatenate(taps, axis=-1), Ho, Wo


def _fused_conv1_shortcut(x_nhwc, wf, bias_f, Cout, stride):
    """Fused conv1(3x1)+BN1+LeakyReLU and shortcut 1x1 conv+BN in one matmul."""
    B = x_nhwc.shape[0]
    patches, Ho, Wo = _shift_patches_h(x_nhwc, kh=3, ph=1, stride=stride)
    M = B * Ho * Wo
    K = patches.shape[-1]
    N = 2 * Cout
    patches = patches.reshape(M, K)

    tm = _pick_tm(M, K, N)
    grid = (pl.cdiv(M, tm),)
    cost = pl.CostEstimate(flops=2 * M * K * N, transcendentals=0,
                           bytes_accessed=4 * (M * K + K * N + M * N))

    out1, sc = pl.pallas_call(
        functools.partial(_fused_conv1_shortcut_kernel, n1=Cout),
        out_shape=(jax.ShapeDtypeStruct((M, Cout), jnp.float32),
                   jax.ShapeDtypeStruct((M, Cout), jnp.float32)),
        grid=grid,
        in_specs=[
            pl.BlockSpec((tm, K), lambda i: (i, 0)),
            pl.BlockSpec((K, N), lambda i: (0, 0)),
            pl.BlockSpec((1, N), lambda i: (0, 0)),
        ],
        out_specs=(pl.BlockSpec((tm, Cout), lambda i: (i, 0)),
                   pl.BlockSpec((tm, Cout), lambda i: (i, 0))),
        compiler_params=pltpu.CompilerParams(
            dimension_semantics=("parallel",),
            vmem_limit_bytes=_vmem_limit(tm, K, N)),
        cost_estimate=cost,
    )(patches, wf, bias_f)
    return out1, sc, Ho, Wo


def _conv_matmul(patches, w, bias, *, leaky):
    """Generic conv-as-matmul (BN already folded into w / bias)."""
    M, K = patches.shape
    N = w.shape[1]
    tm = _pick_tm(M, K, N)
    grid = (pl.cdiv(M, tm),)
    cost = pl.CostEstimate(flops=2 * M * K * N, transcendentals=0,
                           bytes_accessed=4 * (M * K + K * N + M * N))
    return pl.pallas_call(
        functools.partial(_matmul_bias_kernel, leaky=leaky),
        out_shape=jax.ShapeDtypeStruct((M, N), jnp.float32),
        grid=grid,
        in_specs=[
            pl.BlockSpec((tm, K), lambda i: (i, 0)),
            pl.BlockSpec((K, N), lambda i: (0, 0)),
            pl.BlockSpec((1, N), lambda i: (0, 0)),
        ],
        out_specs=pl.BlockSpec((tm, N), lambda i: (i, 0)),
        compiler_params=pltpu.CompilerParams(
            dimension_semantics=("parallel",),
            vmem_limit_bytes=_vmem_limit(tm, K, N)),
        cost_estimate=cost,
    )(patches, w, bias)


def _se_residual(out2, sc, w1t, w2t, B, HW, C):
    """SE gates (tiled pool+FC) then tiled excite + residual + LeakyReLU."""
    x3 = out2.reshape(B, HW, C)
    sc3 = sc.reshape(B, HW, C)
    thw = HW if HW <= 512 else 512
    nhw = pl.cdiv(HW, thw)

    gates = pl.pallas_call(
        functools.partial(_se_gate_kernel, hw_total=HW, thw=thw),
        out_shape=jax.ShapeDtypeStruct((B, C), jnp.float32),
        grid=(nhw,),
        in_specs=[
            pl.BlockSpec((B, thw, C), lambda j: (0, j, 0)),
            pl.BlockSpec(w1t.shape, lambda j: (0, 0)),
            pl.BlockSpec(w2t.shape, lambda j: (0, 0)),
        ],
        out_specs=pl.BlockSpec((B, C), lambda j: (0, 0)),
        scratch_shapes=[pltpu.VMEM((B, C), jnp.float32)],
        compiler_params=pltpu.CompilerParams(dimension_semantics=("arbitrary",)),
        cost_estimate=pl.CostEstimate(
            flops=B * HW * C + 4 * B * C * max(w1t.shape[1], 1),
            transcendentals=B * C,
            bytes_accessed=4 * (B * HW * C + B * C)),
    )(x3, w1t, w2t)

    gates3 = gates.reshape(B, 1, C)

    y = pl.pallas_call(
        _se_residual_kernel,
        out_shape=jax.ShapeDtypeStruct((B, HW, C), jnp.float32),
        grid=(B, nhw),
        in_specs=[
            pl.BlockSpec((1, thw, C), lambda b, j: (b, j, 0)),
            pl.BlockSpec((1, thw, C), lambda b, j: (b, j, 0)),
            pl.BlockSpec((1, 1, C), lambda b, j: (b, 0, 0)),
        ],
        out_specs=pl.BlockSpec((1, thw, C), lambda b, j: (b, j, 0)),
        compiler_params=pltpu.CompilerParams(
            dimension_semantics=("parallel", "parallel")),
        cost_estimate=pl.CostEstimate(
            flops=3 * B * HW * C, transcendentals=0,
            bytes_accessed=4 * 3 * B * HW * C),
    )(x3, sc3, gates3)
    return y


# ---------------------------------------------------------------------------
# BasicBlock forward
# ---------------------------------------------------------------------------
def basic_block_forward(x, p, *, stride=1, height=1):
    """BasicBlock (fusion=['se'], groups=1, in_planes != out_planes so the
    shortcut is Conv1x1 + BN) with inference-mode BatchNorm."""
    assert height == 1, "fused conv1+shortcut path assumes height == 1"
    # TODO(synk): height > 1 would need an unfused shortcut (output widths of
    # conv1 and the 1x1 shortcut differ), as in the original PyTorch module.

    B, Cin, H, W = x.shape
    Cout = p["w_conv1"].shape[0]

    # ---- host-side BN folding + weight fusion (cheap, jit-cacheable) ----
    w1m = (p["w_conv1"].transpose(2, 3, 1, 0).reshape(3 * Cin, Cout)
           * p["bn1_scale"][None, :])
    wscm = p["w_sc"].reshape(Cout, Cin).T * p["bnsc_scale"][None, :]
    wf = jnp.zeros((3 * Cin, 2 * Cout), jnp.float32)
    wf = wf.at[:, :Cout].set(w1m)
    wf = wf.at[Cin:2 * Cin, Cout:].set(wscm)        # 1x1 == centre tap of 3x1
    bias_f = jnp.concatenate([p["bn1_bias"], p["bnsc_bias"]])[None, :]

    w2m = (p["w_conv2"].transpose(2, 3, 1, 0).reshape(3 * Cout, Cout)
           * p["bn2_scale"][None, :])
    bias2 = p["bn2_bias"][None, :]

    # ---- NCHW -> NHWC exactly once ----
    x_nhwc = x.transpose(0, 2, 3, 1)

    # ---- conv1 + bn1 + LeakyReLU, fused with shortcut 1x1 conv + bn ----
    out1, sc, Ho, Wo = _fused_conv1_shortcut(x_nhwc, wf, bias_f, Cout, stride)

    # ---- conv2 + bn2 (no activation) ----
    out1_nhwc = out1.reshape(B, Ho, Wo, Cout)
    patches2, Ho2, Wo2 = _shift_patches_h(out1_nhwc, kh=3, ph=1, stride=1)
    patches2 = patches2.reshape(B * Ho2 * Wo2, 3 * Cout)
    out2 = _conv_matmul(patches2, w2m, bias2, leaky=False)

    # ---- SE excite + residual add + final LeakyReLU ----
    HW = Ho2 * Wo2
    y = _se_residual(out2, sc, p["se_w1"].T, p["se_w2"].T, B, HW, Cout)

    # ---- NHWC -> NCHW exactly once ----
    return y.reshape(B, Ho2, Wo2, Cout).transpose(0, 3, 1, 2)


# ---------------------------------------------------------------------------
# Deterministic parameter init + pure-JAX reference (correctness check)
# ---------------------------------------------------------------------------
def _bn_affine(key, c):
    kg, kb, km, kv = jax.random.split(key, 4)
    gamma = jax.random.uniform(kg, (c,), minval=0.5, maxval=1.5)
    beta = jax.random.normal(kb, (c,)) * 0.1
    mean = jax.random.normal(km, (c,)) * 0.1
    var = jax.random.uniform(kv, (c,), minval=0.5, maxval=1.5)
    scale = gamma / jnp.sqrt(var + BN_EPS)
    bias = beta - mean * scale
    return scale.astype(jnp.float32), bias.astype(jnp.float32)


def init_params(key, in_planes, out_planes, r=16, height=1):
    mid = max(out_planes // r, 1)
    ks = jax.random.split(key, 8)
    p = {}
    p["w_conv1"] = (jax.random.normal(ks[0], (out_planes, in_planes, 3, height)) * 0.1).astype(jnp.float32)
    p["w_conv2"] = (jax.random.normal(ks[1], (out_planes, out_planes, 3, 1)) * 0.1).astype(jnp.float32)
    p["w_sc"] = (jax.random.normal(ks[2], (out_planes, in_planes, 1, 1)) * 0.1).astype(jnp.float32)
    p["bn1_scale"], p["bn1_bias"] = _bn_affine(ks[3], out_planes)
    p["bn2_scale"], p["bn2_bias"] = _bn_affine(ks[4], out_planes)
    p["bnsc_scale"], p["bnsc_bias"] = _bn_affine(ks[5], out_planes)
    p["se_w1"] = (jax.random.normal(ks[6], (mid, out_planes)) * 0.2).astype(jnp.float32)   # Linear(c, mid)
    p["se_w2"] = (jax.random.normal(ks[7], (out_planes, mid)) * 0.2).astype(jnp.float32)   # Linear(mid, c)
    return p


def ref_forward(x, p, *, stride=1):
    hi = jax.lax.Precision.HIGHEST

    def conv(x, w, s, pad):
        return jax.lax.conv_general_dilated(
            x, w, window_strides=(s, s),
            padding=((pad[0], pad[0]), (pad[1], pad[1])),
            dimension_numbers=("NCHW", "OIHW", "NCHW"), precision=hi)

    def bn(x, s, b):
        return x * s[None, :, None, None] + b[None, :, None, None]

    def lrelu(x):
        return jnp.where(x >= 0, x, NEG_SLOPE * x)

    out = lrelu(bn(conv(x, p["w_conv1"], stride, (1, 0)), p["bn1_scale"], p["bn1_bias"]))
    out = bn(conv(out, p["w_conv2"], 1, (1, 0)), p["bn2_scale"], p["bn2_bias"])
    y = jnp.mean(out, axis=(2, 3))
    y = jnp.maximum(jnp.dot(y, p["se_w1"].T, precision=hi), 0.0)
    y = jax.nn.sigmoid(jnp.dot(y, p["se_w2"].T, precision=hi))
    out = out * y[:, :, None, None]
    sc = bn(conv(x, p["w_sc"], stride, (0, 0)), p["bnsc_scale"], p["bnsc_bias"])
    return lrelu(out + sc)


# ---------------------------------------------------------------------------
if __name__ == "__main__":
    key = jax.random.PRNGKey(0)
    kx, kp = jax.random.split(key)

    B, in_planes, out_planes, H, W = 2, 16, 32, 16, 8   # small, NCHW
    x = jax.random.normal(kx, (B, in_planes, H, W), dtype=jnp.float32)
    params = init_params(kp, in_planes, out_planes)

    out = jax.block_until_ready(basic_block_forward(x, params, stride=1))
    ref = jax.block_until_ready(ref_forward(x, params, stride=1))

    assert out.shape == (B, out_planes, H, W), out.shape
    assert jnp.allclose(out, ref, atol=2e-3, rtol=2e-3), float(jnp.max(jnp.abs(out - ref)))
    print("KERNEL_OK")
</pallas_src>

<mosaic_0001>
module attributes {stable_mosaic.version = 11 : i64} {
  func.func @_fused_conv1_shortcut_kernel(%arg0: i32, %arg1: memref<256x48xf32, #tpu.memory_space<vmem>>, %arg2: memref<48x64xf32, #tpu.memory_space<vmem>>, %arg3: memref<1x64xf32, #tpu.memory_space<vmem>>, %arg4: memref<256x32xf32, #tpu.memory_space<vmem>>, %arg5: memref<256x32xf32, #tpu.memory_space<vmem>>) attributes {dimension_semantics = [#tpu.dimension_semantics<parallel>], iteration_bounds = array<i64: 1>, scalar_prefetch = 0 : i64, scratch_operands = 0 : i64, tpu.core_type = #tpu.core_type<tc>, window_params = [{transform_indices = @transform_0, window_bounds = array<i64: 256, 48>}, {pipeline_mode = #tpu.pipeline_mode<synchronous>, transform_indices = @transform_1, window_bounds = array<i64: 48, 64>}, {pipeline_mode = #tpu.pipeline_mode<synchronous>, transform_indices = @transform_2, window_bounds = array<i64: 1, 64>}, {transform_indices = @transform_3, window_bounds = array<i64: 256, 32>}, {transform_indices = @transform_4, window_bounds = array<i64: 256, 32>}]} {
    %c0 = arith.constant 0 : index
    %c0_0 = arith.constant 0 : index
    %0 = vector.load %arg1[%c0, %c0_0] : memref<256x48xf32, #tpu.memory_space<vmem>>, vector<256x48xf32>
    %c0_1 = arith.constant 0 : index
    %c0_2 = arith.constant 0 : index
    %1 = vector.load %arg2[%c0_1, %c0_2] : memref<48x64xf32, #tpu.memory_space<vmem>>, vector<48x64xf32>
    %cst = arith.constant dense<0.000000e+00> : vector<256x64xf32>
    %2 = tpu.matmul %0, %1, %cst {dimension_numbers = #tpu.dot_dimension_numbers<[1], [0], [0], [1], [0, 0, 1, 1], [], []>} : vector<256x48xf32>, vector<48x64xf32>, vector<256x64xf32> -> vector<256x64xf32>
    %c0_3 = arith.constant 0 : index
    %c0_4 = arith.constant 0 : index
    %3 = vector.load %arg3[%c0_3, %c0_4] : memref<1x64xf32, #tpu.memory_space<vmem>>, vector<1x64xf32>
    %4 = vector.broadcast %3 : vector<1x64xf32> to vector<256x64xf32>
    %5 = arith.addf %2, %4 : vector<256x64xf32>
    %6 = vector.extract_strided_slice %5 {offsets = [0, 0], sizes = [256, 32], strides = [1, 1]} : vector<256x64xf32> to vector<256x32xf32>
    %cst_5 = arith.constant 0.000000e+00 : f32
    %7 = vector.broadcast %cst_5 : f32 to vector<256x32xf32>
    %8 = arith.cmpf oge, %6, %7 : vector<256x32xf32>
    %cst_6 = arith.constant 0.00999999977 : f32
    %9 = vector.broadcast %cst_6 : f32 to vector<256x32xf32>
    %10 = arith.mulf %9, %6 : vector<256x32xf32>
    %11 = arith.select %8, %6, %10 : vector<256x32xi1>, vector<256x32xf32>
    %c0_7 = arith.constant 0 : index
    %c0_8 = arith.constant 0 : index
    %12 = vector.load %arg4[%c0_7, %c0_8] : memref<256x32xf32, #tpu.memory_space<vmem>>, vector<256x32xf32>
    tpu.vector_store %arg4[%c0_7, %c0_8], %11 {strides = array<i32>} : memref<256x32xf32, #tpu.memory_space<vmem>>, vector<256x32xf32>,
    %13 = vector.extract_strided_slice %5 {offsets = [0, 32], sizes = [256, 32], strides = [1, 1]} : vector<256x64xf32> to vector<256x32xf32>
    %c0_9 = arith.constant 0 : index
    %c0_10 = arith.constant 0 : index
    %14 = vector.load %arg5[%c0_9, %c0_10] : memref<256x32xf32, #tpu.memory_space<vmem>>, vector<256x32xf32>
    tpu.vector_store %arg5[%c0_9, %c0_10], %13 {strides = array<i32>} : memref<256x32xf32, #tpu.memory_space<vmem>>, vector<256x32xf32>,
    return
  }
  func.func @transform_0(%arg0: i32) -> (i32, i32) {
    %c0_i32 = arith.constant 0 : i32
    %c0_i32_0 = arith.constant 0 : i32
    return %arg0, %c0_i32 : i32, i32
  }
  func.func @transform_1(%arg0: i32) -> (i32, i32) {
    %c0_i32 = arith.constant 0 : i32
    %c0_i32_0 = arith.constant 0 : i32
    %c0_i32_1 = arith.constant 0 : i32
    return %c0_i32, %c0_i32_0 : i32, i32
  }
  func.func @transform_2(%arg0: i32) -> (i32, i32) {
    %c0_i32 = arith.constant 0 : i32
    %c0_i32_0 = arith.constant 0 : i32
    %c0_i32_1 = arith.constant 0 : i32
    return %c0_i32, %c0_i32_0 : i32, i32
  }
  func.func @transform_3(%arg0: i32) -> (i32, i32) {
    %c0_i32 = arith.constant 0 : i32
    %c0_i32_0 = arith.constant 0 : i32
    return %arg0, %c0_i32 : i32, i32
  }
  func.func @transform_4(%arg0: i32) -> (i32, i32) {
    %c0_i32 = arith.constant 0 : i32
    %c0_i32_0 = arith.constant 0 : i32
    return %arg0, %c0_i32 : i32, i32
  }
}

</mosaic_0001>

<bundles_post_ra>
// kernel: tpu_custom_call.1
= control target key start
LH: loop header
LB: loop body
LE: loop exit
PB: predicated region body
PF: predicated region fallthrough
CT: control target
= control target key end

     0   :  { %vm61_vm0 = vcmask 392192   ;;  %vm479_vm1 = vcmask 261120   ;;  %s1417_s1 = inlined_call_operand.vmem [shape: f32[48,64], index: 1, kind: input, shape index: {}]   ;;  %s1418_s0 = inlined_call_operand.vmem [shape: f32[256,48], index: 0, kind: input, shape index: {}]   ;;  %s1419_s2 = inlined_call_operand.vmem [shape: f32[1,64], index: 2, kind: input, shape index: {}]   ;;  %s1420_s3 = inlined_call_operand.vmem [shape: f32[256,32], index: 3, kind: output, shape index: {0}]   ;;  %s1421_s4 = inlined_call_operand.vmem [shape: f32[256,32], index: 4, kind: output, shape index: {1}]  }
   0x1   :  { %v48_v0 = vld [vmem:[%s1417_s1] sm:$0xff]  ;;  %v49_v1 = vld [vmem:[%s1417_s1 + $0x8] sm:$0xff]  ;;  %v50_v2 = vld [vmem:[%s1417_s1 + $0x10] sm:$0xff] }
   0x2   :  { %v811_v3 = vpack.c.bf16 %v49_v1, %v48_v0  ;;  %v51_v4 = vld [vmem:[%s1417_s1 + $0x18] sm:$0xff]  ;;  %v52_v6 = vld [vmem:[%s1417_s1 + $0x20] sm:$0xff]  ;;  %v53_v7 = vld [vmem:[%s1417_s1 + $0x28] sm:$0xff] }
   0x3   :  { %v815_v5 = vpack.c.bf16 %v51_v4, %v50_v2  ;;  %v16_v8 = vld [vmem:[%s1418_s0] sm:$0xff]  ;;  %v819_v10 = vpack.c.bf16 %v53_v7, %v52_v6  ;;  %v17_v11 = vld [vmem:[%s1418_s0 + $0x8] sm:$0xff]  ;;  %v18_v13 = vld [vmem:[%s1418_s0 + $0x10] sm:$0xff] }
   0x4   :  { %812 = vmatprep.subr.bf16.mxu0 %v811_v3  ;;  %823 = vmatprep.subr.bf16.mxu1 %v811_v3  ;;  %v32_v9 = vld [vmem:[%s1418_s0 + $0x80] sm:$0xff]  ;;  %v33_v12 = vld [vmem:[%s1418_s0 + $0x88] sm:$0xff]  ;;  %v34_v14 = vld [vmem:[%s1418_s0 + $0x90] sm:$0xff] }
   0x5   :  { %814 = vmatpush3.bf16.msra.mxu0 %v811_v3  ;;  %826 = vmatpush3.bf16.msra.mxu1 %v811_v3  ;;  %v19_v15 = vld [vmem:[%s1418_s0 + $0x18] sm:$0xff]  ;;  %v20_v17 = vld [vmem:[%s1418_s0 + $0x20] sm:$0xff]  ;;  %v21_v19 = vld [vmem:[%s1418_s0 + $0x28] sm:$0xff] }
   0x6   :  { %816 = vmatprep.subr.bf16.mxu0 %v815_v5  ;;  %824 = vmatprep.subr.bf16.mxu1 %v815_v5  ;;  %v35_v16 = vld [vmem:[%s1418_s0 + $0x98] sm:$0xff]  ;;  %v36_v18 = vld [vmem:[%s1418_s0 + $0xa0] sm:$0xff]  ;;  %v37_v20 = vld [vmem:[%s1418_s0 + $0xa8] sm:$0xff] }
   0x7   :  { %763 = vmatprep.mubr.msk.f32.mxu0 %vm61_vm0, %v16_v8  ;;  %787 = vmatprep.mubr.msk.f32.mxu1 %vm61_vm0, %v32_v9  ;;  %v22_v21 = vld [vmem:[%s1418_s0 + $0x30] sm:$0xff]  ;;  %v23_v23 = vld [vmem:[%s1418_s0 + $0x38] sm:$0xff]  ;;  %v24_v25 = vld [vmem:[%s1418_s0 + $0x40] sm:$0xff] }
   0x8   :  { %v38_v22 = vld [vmem:[%s1418_s0 + $0xb0] sm:$0xff]  ;;  %v39_v24 = vld [vmem:[%s1418_s0 + $0xb8] sm:$0xff]  ;;  %v40_v26 = vld [vmem:[%s1418_s0 + $0xc0] sm:$0xff] }
   0x9   :  { %818 = vmatpush3.bf16.msra.mxu0 %v815_v5  ;;  %827 = vmatpush3.bf16.msra.mxu1 %v815_v5  ;;  %v25_v27 = vld [vmem:[%s1418_s0 + $0x48] sm:$0xff]  ;;  %v26_v29 = vld [vmem:[%s1418_s0 + $0x50] sm:$0xff]  ;;  %v27_v31 = vld [vmem:[%s1418_s0 + $0x58] sm:$0xff] }
   0xa   :  { %820 = vmatprep.subr.bf16.mxu0 %v819_v10  ;;  %825 = vmatprep.subr.bf16.mxu1 %v819_v10  ;;  %v41_v28 = vld [vmem:[%s1418_s0 + $0xc8] sm:$0xff]  ;;  %v42_v30 = vld [vmem:[%s1418_s0 + $0xd0] sm:$0xff]  ;;  %v43_v32 = vld [vmem:[%s1418_s0 + $0xd8] sm:$0xff] }
   0xb   :  { %v28_v33 = vld [vmem:[%s1418_s0 + $0x60] sm:$0xff]  ;;  %v29_v35 = vld [vmem:[%s1418_s0 + $0x68] sm:$0xff]  ;;  %v30_v37 = vld [vmem:[%s1418_s0 + $0x70] sm:$0xff] }
   0xc   :  { %v44_v34 = vld [vmem:[%s1418_s0 + $0xe0] sm:$0xff]  ;;  %v45_v36 = vld [vmem:[%s1418_s0 + $0xe8] sm:$0xff]  ;;  %v46_v38 = vld [vmem:[%s1418_s0 + $0xf0] sm:$0xff] }
   0xd   :  { %822 = vmatpush3.bf16.msra.mxu0 %v819_v10  ;;  %828 = vmatpush3.bf16.msra.mxu1 %v819_v10  ;;  %v31_v39 = vld [vmem:[%s1418_s0 + $0x78] sm:$0xff]  ;;  %v1005_v41 = vld [vmem:[%s1419_s2] ss:$0 sm:$0xff] }
   0xe   :  { %v47_v40 = vld [vmem:[%s1418_s0 + $0xf8] sm:$0xff]  ;;  %s830_s0 = smov 96  }
  0x10   :  { %764 = vmatmul.mubr.msk.f32.vlgmr.msra.gmra.mrb[0].mxu0 %vm61_vm0, %v17_v11  ;;  %788 = vmatmul.mubr.msk.f32.vlgmr.msra.gmra.mrb[0].mxu1 %vm61_vm0, %v33_v12 }
  0x11   :  { %766 = vmatprep.mubr.msk.f32.mxu0 %vm61_vm0, %v18_v13  ;;  %790 = vmatprep.mubr.msk.f32.mxu1 %vm61_vm0, %v34_v14 }
  0x14   :  { %767 = vmatmul.mubr.msk.f32.gmra.mrb[2].mxu0 %vm61_vm0, %v19_v15  ;;  %791 = vmatmul.mubr.msk.f32.gmra.mrb[2].mxu1 %vm61_vm0, %v35_v16 }
  0x15   :  { %769 = vmatprep.mubr.msk.f32.mxu0 %vm61_vm0, %v20_v17  ;;  %793 = vmatprep.mubr.msk.f32.mxu1 %vm61_vm0, %v36_v18 }
  0x18   :  { %770 = vmatmul.mubr.msk.f32.gmra.mrb[4].mxu0 %vm61_vm0, %v21_v19  ;;  %794 = vmatmul.mubr.msk.f32.gmra.mrb[4].mxu1 %vm61_vm0, %v37_v20 }
  0x19   :  { %772 = vmatprep.mubr.msk.f32.mxu0 %vm61_vm0, %v22_v21  ;;  %796 = vmatprep.mubr.msk.f32.mxu1 %vm61_vm0, %v38_v22 }
  0x1c   :  { %773 = vmatmul.mubr.msk.f32.gmra.mrb[6].mxu0 %vm61_vm0, %v23_v23  ;;  %797 = vmatmul.mubr.msk.f32.gmra.mrb[6].mxu1 %vm61_vm0, %v39_v24 }
  0x1d   :  { %775 = vmatprep.mubr.msk.f32.mxu0 %vm61_vm0, %v24_v25  ;;  %799 = vmatprep.mubr.msk.f32.mxu1 %vm61_vm0, %v40_v26 }
  0x20   :  { %776 = vmatmul.mubr.msk.f32.gmra.mrb[8].mxu0 %vm61_vm0, %v25_v27  ;;  %800 = vmatmul.mubr.msk.f32.gmra.mrb[8].mxu1 %vm61_vm0, %v41_v28 }
  0x21   :  { %778 = vmatprep.mubr.msk.f32.mxu0 %vm61_vm0, %v26_v29  ;;  %802 = vmatprep.mubr.msk.f32.mxu1 %vm61_vm0, %v42_v30 }
  0x24   :  { %779 = vmatmul.mubr.msk.f32.gmra.mrb[10].mxu0 %vm61_vm0, %v27_v31  ;;  %803 = vmatmul.mubr.msk.f32.gmra.mrb[10].mxu1 %vm61_vm0, %v43_v32 }
  0x25   :  { %781 = vmatprep.mubr.msk.f32.mxu0 %vm61_vm0, %v28_v33  ;;  %805 = vmatprep.mubr.msk.f32.mxu1 %vm61_vm0, %v44_v34 }
  0x28   :  { %782 = vmatmul.mubr.msk.f32.gmra.mrb[12].mxu0 %vm61_vm0, %v29_v35  ;;  %806 = vmatmul.mubr.msk.f32.gmra.mrb[12].mxu1 %vm61_vm0, %v45_v36 }
  0x29   :  { %784 = vmatprep.mubr.msk.f32.mxu0 %vm61_vm0, %v30_v37  ;;  %808 = vmatprep.mubr.msk.f32.mxu1 %vm61_vm0, %v46_v38 }
  0x2c   :  { %785 = vmatmul.mubr.msk.f32.gmra.mrb[14].mxu0 %vm61_vm0, %v31_v39  ;;  %809 = vmatmul.mubr.msk.f32.gmra.mrb[14].mxu1 %vm61_vm0, %v47_v40 }
  0xe3   :  { %v765_v42 = vpop.f32.mrb[0].mxu0  ;;  %v789_v43 = vpop.f32.mrb[0].mxu1 }
  0xe4   :  { %v230_v44 = vadd.f32 %v765_v42, %v1005_v41  ;;  %v310_v45 = vadd.f32 %v789_v43, %v1005_v41  ;;  %v224_v46 = vpop.f32.mrb[1].mxu0  ;;  %v304_v47 = vpop.f32.mrb[1].mxu1 }
  0xe5   :  { %v225_v48 = vadd.f32 %v1005_v41, %v224_v46  ;;  %v305_v49 = vadd.f32 %v1005_v41, %v304_v47 }
  0xe6   :  { %vm384_vm2 = vcmp.ge.f32.partialorder %v230_v44, 0.0  ;;  %v416_v50 = vmul.f32 0.01, %v230_v44  ;;  %vm400_vm3 = vcmp.ge.f32.partialorder %v310_v45, 0.0  ;;  %v432_v51 = vmul.f32 0.01, %v310_v45  ;;  %578 = vrot.lane.b32.xlu1 %v310_v45, %s830_s0  ;;  %546 = vrot.lane.b32.xlu0 %v230_v44, %s830_s0 }
  0xe7   :  { %vm383_vm4 = vcmp.ge.f32.partialorder %v225_v48, 0.0  ;;  %v415_v52 = vmul.f32 0.01, %v225_v48  ;;  %vm399_vm5 = vcmp.ge.f32.partialorder %v305_v49, 0.0  ;;  %v431_v53 = vmul.f32 0.01, %v305_v49 }
  0xe8   :  { %v448_v54 = vsel %vm384_vm2, %v230_v44, %v416_v50  ;;  %v464_v55 = vsel %vm400_vm3, %v310_v45, %v432_v51  ;;  %v768_v56 = vpop.f32.mrb[2].mxu0  ;;  %v792_v57 = vpop.f32.mrb[2].mxu1 }
  0xe9   :  { %481 = vst.msk [vmem:[%s1420_s3 + $0x8] sm:$0xff] %vm479_vm1, %v448_v54  ;;  %497 = vst.msk [vmem:[%s1420_s3 + $0x88] sm:$0xff] %vm479_vm1, %v464_v55  ;;  %v447_v58 = vsel %vm383_vm4, %v225_v48, %v415_v52  ;;  %v463_v59 = vsel %vm399_vm5, %v305_v49, %v431_v53  ;;  %v240_v60 = vadd.f32 %v768_v56, %v1005_v41  ;;  %v234_v61 = vpop.f32.mrb[3].mxu0  ;;  %v314_v63 = vpop.f32.mrb[3].mxu1 }
  0xea   :  { %v320_v62 = vadd.f32 %v792_v57, %v1005_v41  ;;  %480 = vst.msk [vmem:[%s1420_s3] sm:$0xff] %vm479_vm1, %v447_v58  ;;  %496 = vst.msk [vmem:[%s1420_s3 + $0x80] sm:$0xff] %vm479_vm1, %v463_v59  ;;  %v235_v0 = vadd.f32 %v1005_v41, %v234_v61  ;;  %v315_v1 = vadd.f32 %v1005_v41, %v314_v63  ;;  %544 = vrot.lane.b32.xlu0 %v225_v48, %s830_s0 }
  0xeb   :  { %vm386_vm6 = vcmp.ge.f32.partialorder %v240_v60, 0.0  ;;  %v418_v2 = vmul.f32 0.01, %v240_v60  ;;  %550 = vrot.lane.b32.xlu1 %v240_v60, %s830_s0  ;;  %v771_v8 = vpop.f32.mrb[4].mxu0  ;;  %v795_v9 = vpop.f32.mrb[4].mxu1 }
  0xec   :  { %vm402_vm7 = vcmp.ge.f32.partialorder %v320_v62, 0.0  ;;  %v434_v3 = vmul.f32 0.01, %v320_v62  ;;  %vm385_vm8 = vcmp.ge.f32.partialorder %v235_v0, 0.0  ;;  %v417_v4 = vmul.f32 0.01, %v235_v0 }
  0xed   :  { %vm401_vm9 = vcmp.ge.f32.partialorder %v315_v1, 0.0  ;;  %v433_v5 = vmul.f32 0.01, %v315_v1  ;;  %v450_v6 = vsel %vm386_vm6, %v240_v60, %v418_v2  ;;  %v250_v12 = vadd.f32 %v771_v8, %v1005_v41  ;;  %v244_v13 = vpop.f32.mrb[5].mxu0  ;;  %v324_v15 = vpop.f32.mrb[5].mxu1 }
  0xee   :  { %v466_v7 = vsel %vm402_vm7, %v320_v62, %v434_v3  ;;  %483 = vst.msk [vmem:[%s1420_s3 + $0x18] sm:$0xff] %vm479_vm1, %v450_v6  ;;  %v449_v10 = vsel %vm385_vm8, %v235_v0, %v417_v4  ;;  %576 = vrot.lane.b32.xlu0 %v305_v49, %s830_s0  ;;  %v1046_v14 = vadd.f32 %v795_v9, %v1005_v41 }
  0xef   :  { %499 = vst.msk [vmem:[%s1420_s3 + $0x98] sm:$0xff] %vm479_vm1, %v466_v7  ;;  %v465_v11 = vsel %vm401_vm9, %v315_v1, %v433_v5  ;;  %482 = vst.msk [vmem:[%s1420_s3 + $0x10] sm:$0xff] %vm479_vm1, %v449_v10  ;;  %582 = vrot.lane.b32.xlu1 %v320_v62, %s830_s0  ;;  %v245_v16 = vadd.f32 %v1005_v41, %v244_v13  ;;  %v325_v17 = vadd.f32 %v1005_v41, %v324_v15  ;;  %v774_v18 = vpop.f32.mrb[6].mxu0  ;;  %v798_v19 = vpop.f32.mrb[6].mxu1 }
  0xf0   :  { %498 = vst.msk [vmem:[%s1420_s3 + $0x90] sm:$0xff] %vm479_vm1, %v465_v11  ;;  %vm388_vm10 = vcmp.ge.f32.partialorder %v250_v12, 0.0  ;;  %v420_v20 = vmul.f32 0.01, %v250_v12  ;;  %vm404_vm11 = vcmp.ge.f32.partialorder %v1046_v14, 0.0  ;;  %v1064_v26 = vadd.f32 %v774_v18, %v1005_v41  ;;  %v254_v27 = vpop.f32.mrb[7].mxu0 }
  0xf1   :  { %v436_v21 = vmul.f32 0.01, %v1046_v14  ;;  %vm387_vm12 = vcmp.ge.f32.partialorder %v245_v16, 0.0  ;;  %v419_v22 = vmul.f32 0.01, %v245_v16  ;;  %vm403_vm13 = vcmp.ge.f32.partialorder %v325_v17, 0.0 }
  0xf2   :  { %v435_v23 = vmul.f32 0.01, %v325_v17  ;;  %v452_v24 = vsel %vm388_vm10, %v250_v12, %v420_v20  ;;  %580 = vrot.lane.b32.xlu0 %v315_v1, %s830_s0  ;;  %v1067_v28 = vadd.f32 %v798_v19, %v1005_v41  ;;  %v334_v29 = vpop.f32.mrb[7].mxu1  ;;  %v1079_v32 = vadd.f32 %v1005_v41, %v254_v27 }
  0xf3   :  { %v468_v25 = vsel %vm404_vm11, %v1046_v14, %v436_v21  ;;  %485 = vst.msk [vmem:[%s1420_s3 + $0x28] sm:$0xff] %vm479_vm1, %v452_v24  ;;  %v451_v30 = vsel %vm387_vm12, %v245_v16, %v419_v22  ;;  %548 = vrot.lane.b32.xlu1 %v235_v0, %s830_s0  ;;  %v1082_v33 = vadd.f32 %v1005_v41, %v334_v29  ;;  %v777_v34 = vpop.f32.mrb[8].mxu0  ;;  %v801_v35 = vpop.f32.mrb[8].mxu1  ;;  %vm390_vm14 = vcmp.ge.f32.partialorder %v1064_v26, 0.0 }
  0xf4   :  { %501 = vst.msk [vmem:[%s1420_s3 + $0xa8] sm:$0xff] %vm479_vm1, %v468_v25  ;;  %v467_v31 = vsel %vm403_vm13, %v325_v17, %v435_v23  ;;  %484 = vst.msk [vmem:[%s1420_s3 + $0x20] sm:$0xff] %vm479_vm1, %v451_v30  ;;  %v422_v36 = vmul.f32 0.01, %v1064_v26  ;;  %vm406_vm15 = vcmp.ge.f32.partialorder %v1067_v28, 0.0  ;;  %vm389_vm0 = vcmp.ge.f32.partialorder %v1079_v32, 0.0 }
  0xf5   :  { %500 = vst.msk [vmem:[%s1420_s3 + $0xa0] sm:$0xff] %vm479_vm1, %v467_v31  ;;  %v438_v37 = vmul.f32 0.01, %v1067_v28  ;;  %v421_v38 = vmul.f32 0.01, %v1079_v32  ;;  %vm405_vm2 = vcmp.ge.f32.partialorder %v1082_v33, 0.0  ;;  %v1104_v43 = vadd.f32 %v777_v34, %v1005_v41 }
  0xf6   :  { %v437_v39 = vmul.f32 0.01, %v1082_v33  ;;  %552 = vrot.lane.b32.xlu0 %v245_v16, %s830_s0  ;;  %v454_v40 = vsel %vm390_vm14, %v1064_v26, %v422_v36  ;;  %v264_v44 = vpop.f32.mrb[9].mxu0  ;;  %v1107_v45 = vadd.f32 %v801_v35, %v1005_v41  ;;  %v344_v46 = vpop.f32.mrb[9].mxu1 }
  0xf7   :  { %v470_v42 = vsel %vm406_vm15, %v1067_v28, %v438_v37  ;;  %554 = vrot.lane.b32.xlu1 %v250_v12, %s830_s0  ;;  %487 = vst.msk [vmem:[%s1420_s3 + $0x38] sm:$0xff] %vm479_vm1, %v454_v40  ;;  %v453_v47 = vsel %vm389_vm0, %v1079_v32, %v421_v38  ;;  %v1121_v49 = vadd.f32 %v1005_v41, %v264_v44  ;;  %v780_v51 = vpop.f32.mrb[10].mxu0  ;;  %v804_v52 = vpop.f32.mrb[10].mxu1  ;;  %vm392_vm3 = vcmp.ge.f32.partialorder %v1104_v43, 0.0 }
  0xf8   :  { %503 = vst.msk [vmem:[%s1420_s3 + $0xb8] sm:$0xff] %vm479_vm1, %v470_v42  ;;  %v469_v48 = vsel %vm405_vm2, %v1082_v33, %v437_v39  ;;  %v1124_v50 = vadd.f32 %v1005_v41, %v344_v46  ;;  %486 = vst.msk [vmem:[%s1420_s3 + $0x30] sm:$0xff] %vm479_vm1, %v453_v47  ;;  %v424_v53 = vmul.f32 0.01, %v1104_v43  ;;  %vm408_vm4 = vcmp.ge.f32.partialorder %v1107_v45, 0.0  ;;  %v274_v60 = vpop.f32.mrb[11].mxu0 }
  0xf9   :  { %502 = vst.msk [vmem:[%s1420_s3 + $0xb0] sm:$0xff] %vm479_vm1, %v469_v48  ;;  %v440_v54 = vmul.f32 0.01, %v1107_v45  ;;  %vm391_vm5 = vcmp.ge.f32.partialorder %v1121_v49, 0.0  ;;  %v423_v55 = vmul.f32 0.01, %v1121_v49  ;;  %v1146_v59 = vadd.f32 %v780_v51, %v1005_v41 }
  0xfa   :  { %vm407_vm6 = vcmp.ge.f32.partialorder %v1124_v50, 0.0  ;;  %v439_v56 = vmul.f32 0.01, %v1124_v50  ;;  %584 = vrot.lane.b32.xlu0 %v325_v17, %s830_s0  ;;  %v456_v57 = vsel %vm392_vm3, %v1104_v43, %v424_v53  ;;  %v1149_v61 = vadd.f32 %v804_v52, %v1005_v41  ;;  %v354_v62 = vpop.f32.mrb[11].mxu1 }
  0xfb   :  { %v472_v58 = vsel %vm408_vm4, %v1107_v45, %v440_v54  ;;  %586 = vrot.lane.b32.xlu1 %v1046_v14, %s830_s0  ;;  %489 = vst.msk [vmem:[%s1420_s3 + $0x48] sm:$0xff] %vm479_vm1, %v456_v57  ;;  %v455_v63 = vsel %vm391_vm5, %v1121_v49, %v423_v55  ;;  %v1164_v1 = vadd.f32 %v1005_v41, %v274_v60  ;;  %v783_v3 = vpop.f32.mrb[12].mxu0  ;;  %v807_v4 = vpop.f32.mrb[12].mxu1  ;;  %vm394_vm7 = vcmp.ge.f32.partialorder %v1146_v59, 0.0 }
  0xfc   :  { %505 = vst.msk [vmem:[%s1420_s3 + $0xc8] sm:$0xff] %vm479_vm1, %v472_v58  ;;  %v471_v0 = vsel %vm407_vm6, %v1124_v50, %v439_v56  ;;  %v1167_v2 = vadd.f32 %v1005_v41, %v354_v62  ;;  %488 = vst.msk [vmem:[%s1420_s3 + $0x40] sm:$0xff] %vm479_vm1, %v455_v63  ;;  %v426_v5 = vmul.f32 0.01, %v1146_v59  ;;  %vm410_vm8 = vcmp.ge.f32.partialorder %v1149_v61, 0.0  ;;  %v284_v12 = vpop.f32.mrb[13].mxu0 }
  0xfd   :  { %504 = vst.msk [vmem:[%s1420_s3 + $0xc0] sm:$0xff] %vm479_vm1, %v471_v0  ;;  %v442_v6 = vmul.f32 0.01, %v1149_v61  ;;  %vm393_vm9 = vcmp.ge.f32.partialorder %v1164_v1, 0.0  ;;  %v425_v7 = vmul.f32 0.01, %v1164_v1  ;;  %v1190_v11 = vadd.f32 %v783_v3, %v1005_v41 }
  0xfe   :  { %vm409_vm10 = vcmp.ge.f32.partialorder %v1167_v2, 0.0  ;;  %v441_v8 = vmul.f32 0.01, %v1167_v2  ;;  %556 = vrot.lane.b32.xlu0 %v1079_v32, %s830_s0  ;;  %v458_v9 = vsel %vm394_vm7, %v1146_v59, %v426_v5  ;;  %v1193_v13 = vadd.f32 %v807_v4, %v1005_v41  ;;  %v364_v14 = vpop.f32.mrb[13].mxu1 }
  0xff   :  { %v474_v10 = vsel %vm410_vm8, %v1149_v61, %v442_v6  ;;  %558 = vrot.lane.b32.xlu1 %v1064_v26, %s830_s0  ;;  %491 = vst.msk [vmem:[%s1420_s3 + $0x58] sm:$0xff] %vm479_vm1, %v458_v9  ;;  %v457_v15 = vsel %vm393_vm9, %v1164_v1, %v425_v7  ;;  %v285_v17 = vadd.f32 %v1005_v41, %v284_v12  ;;  %v786_v19 = vpop.f32.mrb[14].mxu0  ;;  %v810_v20 = vpop.f32.mrb[14].mxu1  ;;  %vm396_vm11 = vcmp.ge.f32.partialorder %v1190_v11, 0.0 }
 0x100   :  { %507 = vst.msk [vmem:[%s1420_s3 + $0xd8] sm:$0xff] %vm479_vm1, %v474_v10  ;;  %v473_v16 = vsel %vm409_vm10, %v1167_v2, %v441_v8  ;;  %v365_v18 = vadd.f32 %v1005_v41, %v364_v14  ;;  %490 = vst.msk [vmem:[%s1420_s3 + $0x50] sm:$0xff] %vm479_vm1, %v457_v15  ;;  %v428_v21 = vmul.f32 0.01, %v1190_v11  ;;  %vm412_vm12 = vcmp.ge.f32.partialorder %v1193_v13, 0.0  ;;  %v294_v29 = vpop.f32.mrb[15].mxu0 }
 0x101   :  { %506 = vst.msk [vmem:[%s1420_s3 + $0xd0] sm:$0xff] %vm479_vm1, %v473_v16  ;;  %v444_v22 = vmul.f32 0.01, %v1193_v13  ;;  %vm395_vm13 = vcmp.ge.f32.partialorder %v285_v17, 0.0  ;;  %v427_v23 = vmul.f32 0.01, %v285_v17  ;;  %v300_v27 = vadd.f32 %v786_v19, %v1005_v41 }
 0x102   :  { %vm411_vm14 = vcmp.ge.f32.partialorder %v365_v18, 0.0  ;;  %v443_v24 = vmul.f32 0.01, %v365_v18  ;;  %588 = vrot.lane.b32.xlu0 %v1082_v33, %s830_s0  ;;  %v460_v25 = vsel %vm396_vm11, %v1190_v11, %v428_v21  ;;  %v380_v30 = vadd.f32 %v810_v20, %v1005_v41  ;;  %v374_v31 = vpop.f32.mrb[15].mxu1 }
 0x103   :  { %v476_v26 = vsel %vm412_vm12, %v1193_v13, %v444_v22  ;;  %590 = vrot.lane.b32.xlu1 %v1067_v28, %s830_s0  ;;  %493 = vst.msk [vmem:[%s1420_s3 + $0x68] sm:$0xff] %vm479_vm1, %v460_v25  ;;  %v459_v32 = vsel %vm395_vm13, %v285_v17, %v427_v23  ;;  %v295_v34 = vadd.f32 %v1005_v41, %v294_v29  ;;  %vm398_vm15 = vcmp.ge.f32.partialorder %v300_v27, 0.0 }
 0x104   :  { %509 = vst.msk [vmem:[%s1420_s3 + $0xe8] sm:$0xff] %vm479_vm1, %v476_v26  ;;  %v475_v33 = vsel %vm411_vm14, %v365_v18, %v443_v24  ;;  %v375_v35 = vadd.f32 %v1005_v41, %v374_v31  ;;  %492 = vst.msk [vmem:[%s1420_s3 + $0x60] sm:$0xff] %vm479_vm1, %v459_v32  ;;  %v430_v28 = vmul.f32 0.01, %v300_v27  ;;  %vm414_vm0 = vcmp.ge.f32.partialorder %v380_v30, 0.0 }
 0x105   :  { %508 = vst.msk [vmem:[%s1420_s3 + $0xe0] sm:$0xff] %vm479_vm1, %v475_v33  ;;  %v446_v36 = vmul.f32 0.01, %v380_v30  ;;  %vm397_vm2 = vcmp.ge.f32.partialorder %v295_v34, 0.0  ;;  %v429_v37 = vmul.f32 0.01, %v295_v34 }
 0x106   :  { %vm413_vm3 = vcmp.ge.f32.partialorder %v375_v35, 0.0  ;;  %v445_v38 = vmul.f32 0.01, %v375_v35  ;;  %560 = vrot.lane.b32.xlu0 %v1121_v49, %s830_s0  ;;  %v462_v41 = vsel %vm398_vm15, %v300_v27, %v430_v28 }
 0x107   :  { %v478_v39 = vsel %vm414_vm0, %v380_v30, %v446_v36  ;;  %562 = vrot.lane.b32.xlu1 %v1104_v43, %s830_s0  ;;  %495 = vst.msk [vmem:[%s1420_s3 + $0x78] sm:$0xff] %vm479_vm1, %v462_v41  ;;  %v461_v40 = vsel %vm397_vm2, %v295_v34, %v429_v37 }
 0x108   :  { %511 = vst.msk [vmem:[%s1420_s3 + $0xf8] sm:$0xff] %vm479_vm1, %v478_v39  ;;  %v477_v42 = vsel %vm413_vm3, %v375_v35, %v445_v38  ;;  %494 = vst.msk [vmem:[%s1420_s3 + $0x70] sm:$0xff] %vm479_vm1, %v461_v40 }
 0x109   :  { %510 = vst.msk [vmem:[%s1420_s3 + $0xf0] sm:$0xff] %vm479_vm1, %v477_v42 }
 0x10a   :  { %592 = vrot.lane.b32.xlu0 %v1124_v50, %s830_s0 }
 0x10b   :  { %594 = vrot.lane.b32.xlu1 %v1107_v45, %s830_s0 }
 0x10e   :  { %564 = vrot.lane.b32.xlu0 %v1164_v1, %s830_s0 }
 0x10f   :  { %566 = vrot.lane.b32.xlu1 %v1146_v59, %s830_s0 }
 0x112   :  { %596 = vrot.lane.b32.xlu0 %v1167_v2, %s830_s0 }
 0x113   :  { %598 = vrot.lane.b32.xlu1 %v1149_v61, %s830_s0 }
 0x116   :  { %568 = vrot.lane.b32.xlu0 %v285_v17, %s830_s0 }
 0x117   :  { %570 = vrot.lane.b32.xlu1 %v1190_v11, %s830_s0 }
 0x11a   :  { %600 = vrot.lane.b32.xlu0 %v365_v18, %s830_s0 }
 0x11b   :  { %602 = vrot.lane.b32.xlu1 %v1193_v13, %s830_s0 }
 0x11e   :  { %572 = vrot.lane.b32.xlu0 %v295_v34, %s830_s0 }
 0x11f   :  { %574 = vrot.lane.b32.xlu1 %v300_v27, %s830_s0 }
 0x122   :  { %604 = vrot.lane.b32.xlu0 %v375_v35, %s830_s0 }
 0x123   :  { %606 = vrot.lane.b32.xlu1 %v380_v30, %s830_s0 }
 0x158   :  { %v579_v43 = vpop.permute.xlu1 %578  ;;  %v547_v44 = vpop.permute.xlu0 %546 }
 0x159   :  { %657 = vst.msk [vmem:[%s1421_s4 + $0x88] sm:$0xff] %vm479_vm1, %v579_v43  ;;  %641 = vst.msk [vmem:[%s1421_s4 + $0x8] sm:$0xff] %vm479_vm1, %v547_v44 }
 0x15c   :  { %v545_v45 = vpop.permute.xlu0 %544 }
 0x15d   :  { %v551_v46 = vpop.permute.xlu1 %550  ;;  %640 = vst.msk [vmem:[%s1421_s4] sm:$0xff] %vm479_vm1, %v545_v45 }
 0x15e   :  { %643 = vst.msk [vmem:[%s1421_s4 + $0x18] sm:$0xff] %vm479_vm1, %v551_v46 }
 0x160   :  { %v577_v47 = vpop.permute.xlu0 %576 }
 0x161   :  { %v583_v48 = vpop.permute.xlu1 %582  ;;  %656 = vst.msk [vmem:[%s1421_s4 + $0x80] sm:$0xff] %vm479_vm1, %v577_v47 }
 0x162   :  { %659 = vst.msk [vmem:[%s1421_s4 + $0x98] sm:$0xff] %vm479_vm1, %v583_v48 }
 0x164   :  { %v581_v49 = vpop.permute.xlu0 %580 }
 0x165   :  { %v549_v50 = vpop.permute.xlu1 %548  ;;  %658 = vst.msk [vmem:[%s1421_s4 + $0x90] sm:$0xff] %vm479_vm1, %v581_v49 }
 0x166   :  { %642 = vst.msk [vmem:[%s1421_s4 + $0x10] sm:$0xff] %vm479_vm1, %v549_v50 }
 0x168   :  { %v553_v51 = vpop.permute.xlu0 %552 }
 0x169   :  { %v555_v52 = vpop.permute.xlu1 %554  ;;  %644 = vst.msk [vmem:[%s1421_s4 + $0x20] sm:$0xff] %vm479_vm1, %v553_v51 }
 0x16a   :  { %645 = vst.msk [vmem:[%s1421_s4 + $0x28] sm:$0xff] %vm479_vm1, %v555_v52 }
 0x16c   :  { %v585_v53 = vpop.permute.xlu0 %584 }
 0x16d   :  { %v587_v54 = vpop.permute.xlu1 %586  ;;  %660 = vst.msk [vmem:[%s1421_s4 + $0xa0] sm:$0xff] %vm479_vm1, %v585_v53 }
 0x16e   :  { %661 = vst.msk [vmem:[%s1421_s4 + $0xa8] sm:$0xff] %vm479_vm1, %v587_v54 }
 0x170   :  { %v557_v55 = vpop.permute.xlu0 %556 }
 0x171   :  { %v559_v56 = vpop.permute.xlu1 %558  ;;  %646 = vst.msk [vmem:[%s1421_s4 + $0x30] sm:$0xff] %vm479_vm1, %v557_v55 }
 0x172   :  { %647 = vst.msk [vmem:[%s1421_s4 + $0x38] sm:$0xff] %vm479_vm1, %v559_v56 }
 0x174   :  { %v589_v57 = vpop.permute.xlu0 %588 }
 0x175   :  { %v591_v58 = vpop.permute.xlu1 %590  ;;  %662 = vst.msk [vmem:[%s1421_s4 + $0xb0] sm:$0xff] %vm479_vm1, %v589_v57 }
 0x176   :  { %663 = vst.msk [vmem:[%s1421_s4 + $0xb8] sm:$0xff] %vm479_vm1, %v591_v58 }
 0x178   :  { %v561_v59 = vpop.permute.xlu0 %560 }
 0x179   :  { %v563_v60 = vpop.permute.xlu1 %562  ;;  %648 = vst.msk [vmem:[%s1421_s4 + $0x40] sm:$0xff] %vm479_vm1, %v561_v59 }
 0x17a   :  { %649 = vst.msk [vmem:[%s1421_s4 + $0x48] sm:$0xff] %vm479_vm1, %v563_v60 }
 0x17c   :  { %v593_v61 = vpop.permute.xlu0 %592 }
 0x17d   :  { %v595_v62 = vpop.permute.xlu1 %594  ;;  %664 = vst.msk [vmem:[%s1421_s4 + $0xc0] sm:$0xff] %vm479_vm1, %v593_v61 }
 0x17e   :  { %665 = vst.msk [vmem:[%s1421_s4 + $0xc8] sm:$0xff] %vm479_vm1, %v595_v62 }
 0x180   :  { %v565_v63 = vpop.permute.xlu0 %564 }
 0x181   :  { %v567_v0 = vpop.permute.xlu1 %566  ;;  %650 = vst.msk [vmem:[%s1421_s4 + $0x50] sm:$0xff] %vm479_vm1, %v565_v63 }
 0x182   :  { %651 = vst.msk [vmem:[%s1421_s4 + $0x58] sm:$0xff] %vm479_vm1, %v567_v0 }
 0x184   :  { %v597_v1 = vpop.permute.xlu0 %596 }
 0x185   :  { %v599_v2 = vpop.permute.xlu1 %598  ;;  %666 = vst.msk [vmem:[%s1421_s4 + $0xd0] sm:$0xff] %vm479_vm1, %v597_v1 }
 0x186   :  { %667 = vst.msk [vmem:[%s1421_s4 + $0xd8] sm:$0xff] %vm479_vm1, %v599_v2 }
 0x188   :  { %v569_v3 = vpop.permute.xlu0 %568 }
 0x189   :  { %v571_v4 = vpop.permute.xlu1 %570  ;;  %652 = vst.msk [vmem:[%s1421_s4 + $0x60] sm:$0xff] %vm479_vm1, %v569_v3 }
 0x18a   :  { %653 = vst.msk [vmem:[%s1421_s4 + $0x68] sm:$0xff] %vm479_vm1, %v571_v4 }
 0x18c   :  { %v601_v5 = vpop.permute.xlu0 %600 }
 0x18d   :  { %v603_v6 = vpop.permute.xlu1 %602  ;;  %668 = vst.msk [vmem:[%s1421_s4 + $0xe0] sm:$0xff] %vm479_vm1, %v601_v5 }
 0x18e   :  { %669 = vst.msk [vmem:[%s1421_s4 + $0xe8] sm:$0xff] %vm479_vm1, %v603_v6 }
 0x190   :  { %v573_v7 = vpop.permute.xlu0 %572 }
 0x191   :  { %v575_v8 = vpop.permute.xlu1 %574  ;;  %654 = vst.msk [vmem:[%s1421_s4 + $0x70] sm:$0xff] %vm479_vm1, %v573_v7 }
 0x192   :  { %655 = vst.msk [vmem:[%s1421_s4 + $0x78] sm:$0xff] %vm479_vm1, %v575_v8 }
 0x194   :  { %v605_v9 = vpop.permute.xlu0 %604 }
 0x195   :  { %v607_v10 = vpop.permute.xlu1 %606  ;;  %670 = vst.msk [vmem:[%s1421_s4 + $0xf0] sm:$0xff] %vm479_vm1, %v605_v9 }
 0x196   :  { %671 = vst.msk [vmem:[%s1421_s4 + $0xf8] sm:$0xff] %vm479_vm1, %v607_v10 }

</bundles_post_ra>
